<compile_context>
chip_gen: v5e
topology: v5e:2x2
jax: 0.10.0
libtpu: 0.0.40
codegen_flags: <defaults>
</compile_context>

<pallas_src>
import functools

import jax
import jax.numpy as jnp
from jax.experimental import pallas as pl
from jax.experimental.pallas import tpu as pltpu


def _lstm_kernel(x_ref, wih_ref, whh_ref, b_ref, wfc_ref, bfc_ref, o_ref,
                 h_scr, c_scr, *, hidden):
    t = pl.program_id(0)

    @pl.when(t == 0)
    def _init():
        h_scr[...] = jnp.zeros_like(h_scr)
        c_scr[...] = jnp.zeros_like(c_scr)

    x_t = x_ref[0]          # (B, D_in)
    h = h_scr[...]          # (B, H)  f32
    c = c_scr[...]          # (B, H)  f32

    # Gate pre-activations: (B, 4H), f32 accumulation on the MXU.
    gates = jnp.dot(x_t, wih_ref[...], preferred_element_type=jnp.float32)
    gates += jnp.dot(h, whh_ref[...], preferred_element_type=jnp.float32)
    gates += b_ref[...]

    # PyTorch gate order: input, forget, cell (g), output.
    i_g = jax.nn.sigmoid(gates[:, 0 * hidden:1 * hidden])
    f_g = jax.nn.sigmoid(gates[:, 1 * hidden:2 * hidden])
    g_g = jnp.tanh(gates[:, 2 * hidden:3 * hidden])
    o_g = jax.nn.sigmoid(gates[:, 3 * hidden:4 * hidden])

    c_new = f_g * c + i_g * g_g
    h_new = o_g * jnp.tanh(c_new)

    c_scr[...] = c_new
    h_scr[...] = h_new

    # Fused FC head on the final hidden state: y = h_T @ W_fc^T + b_fc.
    @pl.when(t == pl.num_programs(0) - 1)
    def _finalize():
        y = jnp.dot(h_new, wfc_ref[...], preferred_element_type=jnp.float32)
        o_ref[...] = (y + bfc_ref[...]).astype(o_ref.dtype)


def lstm_forward(x, w_ih, w_hh, b_ih, b_hh, w_fc, b_fc):
    """Single-layer batch_first LSTM, then Linear(H, 1) on the last time step.

    x:    (B, T, D_in)
    w_ih: (4H, D_in), w_hh: (4H, H), b_ih/b_hh: (4H,)   (PyTorch layout)
    w_fc: (1, H),     b_fc: (1,)
    Returns (B, 1).
    """
    B, T, D = x.shape
    H4, _ = w_ih.shape
    H = H4 // 4

    # One-time layout plumbing outside the kernel.
    wih_t = jnp.transpose(w_ih)                  # (D, 4H)  (K, N)-major for MXU
    whh_t = jnp.transpose(w_hh)                  # (H, 4H)
    b = (b_ih + b_hh).reshape(1, 4 * H)          # combined bias, added once/step
    wfc_t = jnp.transpose(w_fc)                  # (H, 1)
    bfc = b_fc.reshape(1, 1)
    x_tm = jnp.transpose(x, (1, 0, 2))           # (T, B, D) time-major streaming

    kernel = functools.partial(_lstm_kernel, hidden=H)

    return pl.pallas_call(
        kernel,
        out_shape=jax.ShapeDtypeStruct((B, 1), x.dtype),
        grid_spec=pltpu.PrefetchScalarGridSpec(
            num_scalar_prefetch=0,
            grid=(T,),
            in_specs=[
                # Streamed per-step input slice.
                pl.BlockSpec((1, B, D), lambda t: (t, 0, 0)),
                # Constant block index => weights/bias stay resident in VMEM.
                pl.BlockSpec((D, 4 * H), lambda t: (0, 0)),
                pl.BlockSpec((H, 4 * H), lambda t: (0, 0)),
                pl.BlockSpec((1, 4 * H), lambda t: (0, 0)),
                pl.BlockSpec((H, 1), lambda t: (0, 0)),
                pl.BlockSpec((1, 1), lambda t: (0, 0)),
            ],
            out_specs=pl.BlockSpec((B, 1), lambda t: (0, 0)),
            scratch_shapes=[
                pltpu.VMEM((B, H), jnp.float32),   # h_t
                pltpu.VMEM((B, H), jnp.float32),   # c_t
            ],
        ),
        compiler_params=pltpu.CompilerParams(
            # Recurrence: time steps must execute sequentially.
            dimension_semantics=("arbitrary",)),
    )(x_tm, wih_t, whh_t, b, wfc_t, bfc)


if __name__ == "__main__":
    # Module config: LSTM(input_size=16, nn_dim=32, num_layers=1)
    input_size, nn_dim = 16, 32
    batch, seq = 8, 8

    key = jax.random.PRNGKey(0)
    kx, k1, k2, k3, k4, k5, k6 = jax.random.split(key, 7)

    k_init = 1.0 / (nn_dim ** 0.5)   # PyTorch default LSTM/Linear init scale
    u = lambda kk, shape: jax.random.uniform(kk, shape, jnp.float32,
                                             -k_init, k_init)

    w_ih = u(k1, (4 * nn_dim, input_size))
    w_hh = u(k2, (4 * nn_dim, nn_dim))
    b_ih = u(k3, (4 * nn_dim,))
    b_hh = u(k4, (4 * nn_dim,))
    w_fc = u(k5, (1, nn_dim))
    b_fc = u(k6, (1,))

    x = jax.random.normal(kx, (batch, seq, input_size), dtype=jnp.float32)

    y = lstm_forward(x, w_ih, w_hh, b_ih, b_hh, w_fc, b_fc)
    y = jax.block_until_ready(y)

    # Pure-JAX reference (PyTorch LSTM semantics, gate order i, f, g, o).
    def ref(x, w_ih, w_hh, b_ih, b_hh, w_fc, b_fc):
        B, T, D = x.shape
        H = w_hh.shape[1]

        def step(carry, x_t):
            h, c = carry
            gates = x_t @ w_ih.T + b_ih + h @ w_hh.T + b_hh
            i, f, g, o = jnp.split(gates, 4, axis=-1)
            c = jax.nn.sigmoid(f) * c + jax.nn.sigmoid(i) * jnp.tanh(g)
            h = jax.nn.sigmoid(o) * jnp.tanh(c)
            return (h, c), None

        init = (jnp.zeros((B, H), x.dtype), jnp.zeros((B, H), x.dtype))
        (h_last, _), _ = jax.lax.scan(step, init, jnp.transpose(x, (1, 0, 2)))
        return h_last @ w_fc.T + b_fc

    y_ref = ref(x, w_ih, w_hh, b_ih, b_hh, w_fc, b_fc)
    assert y.shape == (batch, 1)
    assert jnp.allclose(y, y_ref, atol=1e-4, rtol=1e-4), (
        float(jnp.max(jnp.abs(y - y_ref))))

    print("KERNEL_OK")
</pallas_src>

<mosaic_0001>
module attributes {stable_mosaic.version = 11 : i64} {
  func.func @_lstm_kernel(%arg0: i32, %arg1: memref<1x8x16xf32, #tpu.memory_space<vmem>>, %arg2: memref<16x128xf32, #tpu.memory_space<vmem>>, %arg3: memref<32x128xf32, #tpu.memory_space<vmem>>, %arg4: memref<1x128xf32, #tpu.memory_space<vmem>>, %arg5: memref<32x1xf32, #tpu.memory_space<vmem>>, %arg6: memref<1x1xf32, #tpu.memory_space<vmem>>, %arg7: memref<8x1xf32, #tpu.memory_space<vmem>>, %arg8: memref<8x32xf32, #tpu.memory_space<vmem>>, %arg9: memref<8x32xf32, #tpu.memory_space<vmem>>) attributes {dimension_semantics = [#tpu.dimension_semantics<arbitrary>], iteration_bounds = array<i64: 8>, scalar_prefetch = 0 : i64, scratch_operands = 2 : i64, tpu.core_type = #tpu.core_type<tc>, window_params = [{transform_indices = @transform_0, window_bounds = array<i64: 1, 8, 16>}, {pipeline_mode = #tpu.pipeline_mode<synchronous>, transform_indices = @transform_1, window_bounds = array<i64: 16, 128>}, {pipeline_mode = #tpu.pipeline_mode<synchronous>, transform_indices = @transform_2, window_bounds = array<i64: 32, 128>}, {pipeline_mode = #tpu.pipeline_mode<synchronous>, transform_indices = @transform_3, window_bounds = array<i64: 1, 128>}, {pipeline_mode = #tpu.pipeline_mode<synchronous>, transform_indices = @transform_4, window_bounds = array<i64: 32, 1>}, {pipeline_mode = #tpu.pipeline_mode<synchronous>, transform_indices = @transform_5, window_bounds = array<i64: 1, 1>}, {pipeline_mode = #tpu.pipeline_mode<synchronous>, transform_indices = @transform_6, window_bounds = array<i64: 8, 1>}]} {
    %c0_i32 = arith.constant 0 : i32
    %0 = arith.cmpi eq, %arg0, %c0_i32 : i32
    %1 = arith.extui %0 : i1 to i32
    %c0_i32_0 = arith.constant 0 : i32
    %2 = arith.cmpi ne, %1, %c0_i32_0 : i32
    scf.if %2 {
      %cst_22 = arith.constant 0.000000e+00 : f32
      %45 = vector.broadcast %cst_22 : f32 to vector<8x32xf32>
      %c0_23 = arith.constant 0 : index
      %c0_24 = arith.constant 0 : index
      %46 = vector.load %arg8[%c0_23, %c0_24] : memref<8x32xf32, #tpu.memory_space<vmem>>, vector<8x32xf32>
      tpu.vector_store %arg8[%c0_23, %c0_24], %45 {strides = array<i32>} : memref<8x32xf32, #tpu.memory_space<vmem>>, vector<8x32xf32>,
      %cst_25 = arith.constant 0.000000e+00 : f32
      %47 = vector.broadcast %cst_25 : f32 to vector<8x32xf32>
      %c0_26 = arith.constant 0 : index
      %c0_27 = arith.constant 0 : index
      %48 = vector.load %arg9[%c0_26, %c0_27] : memref<8x32xf32, #tpu.memory_space<vmem>>, vector<8x32xf32>
      tpu.vector_store %arg9[%c0_26, %c0_27], %47 {strides = array<i32>} : memref<8x32xf32, #tpu.memory_space<vmem>>, vector<8x32xf32>,
    } else {
    }
    %c0 = arith.constant 0 : index
    %c0_1 = arith.constant 0 : index
    %c0_2 = arith.constant 0 : index
    %3 = vector.load %arg1[%c0, %c0_1, %c0_2] : memref<1x8x16xf32, #tpu.memory_space<vmem>>, vector<1x8x16xf32>
    %4 = vector.shape_cast %3 : vector<1x8x16xf32> to vector<8x16xf32>
    %c0_3 = arith.constant 0 : index
    %c0_4 = arith.constant 0 : index
    %5 = vector.load %arg8[%c0_3, %c0_4] : memref<8x32xf32, #tpu.memory_space<vmem>>, vector<8x32xf32>
    %c0_5 = arith.constant 0 : index
    %c0_6 = arith.constant 0 : index
    %6 = vector.load %arg9[%c0_5, %c0_6] : memref<8x32xf32, #tpu.memory_space<vmem>>, vector<8x32xf32>
    %c0_7 = arith.constant 0 : index
    %c0_8 = arith.constant 0 : index
    %7 = vector.load %arg2[%c0_7, %c0_8] : memref<16x128xf32, #tpu.memory_space<vmem>>, vector<16x128xf32>
    %cst = arith.constant dense<0.000000e+00> : vector<8x128xf32>
    %8 = tpu.matmul %4, %7, %cst {dimension_numbers = #tpu.dot_dimension_numbers<[1], [0], [0], [1], [0, 0, 1, 1], [], []>} : vector<8x16xf32>, vector<16x128xf32>, vector<8x128xf32> -> vector<8x128xf32>
    %c0_9 = arith.constant 0 : index
    %c0_10 = arith.constant 0 : index
    %9 = vector.load %arg3[%c0_9, %c0_10] : memref<32x128xf32, #tpu.memory_space<vmem>>, vector<32x128xf32>
    %cst_11 = arith.constant dense<0.000000e+00> : vector<8x128xf32>
    %10 = tpu.matmul %5, %9, %cst_11 {dimension_numbers = #tpu.dot_dimension_numbers<[1], [0], [0], [1], [0, 0, 1, 1], [], []>} : vector<8x32xf32>, vector<32x128xf32>, vector<8x128xf32> -> vector<8x128xf32>
    %11 = arith.addf %8, %10 : vector<8x128xf32>
    %c0_12 = arith.constant 0 : index
    %c0_13 = arith.constant 0 : index
    %12 = vector.load %arg4[%c0_12, %c0_13] : memref<1x128xf32, #tpu.memory_space<vmem>>, vector<1x128xf32>
    %13 = vector.broadcast %12 : vector<1x128xf32> to vector<8x128xf32>
    %14 = arith.addf %11, %13 : vector<8x128xf32>
    %15 = vector.extract_strided_slice %14 {offsets = [0, 0], sizes = [8, 32], strides = [1, 1]} : vector<8x128xf32> to vector<8x32xf32>
    %16 = arith.negf %15 : vector<8x32xf32>
    %17 = math.exp %16 : vector<8x32xf32>
    %cst_14 = arith.constant 1.000000e+00 : f32
    %18 = vector.broadcast %cst_14 : f32 to vector<8x32xf32>
    %19 = arith.addf %18, %17 : vector<8x32xf32>
    %20 = arith.divf %18, %19 : vector<8x32xf32>
    %21 = vector.extract_strided_slice %14 {offsets = [0, 32], sizes = [8, 32], strides = [1, 1]} : vector<8x128xf32> to vector<8x32xf32>
    %22 = arith.negf %21 : vector<8x32xf32>
    %23 = math.exp %22 : vector<8x32xf32>
    %cst_15 = arith.constant 1.000000e+00 : f32
    %24 = vector.broadcast %cst_15 : f32 to vector<8x32xf32>
    %25 = arith.addf %24, %23 : vector<8x32xf32>
    %26 = arith.divf %24, %25 : vector<8x32xf32>
    %27 = vector.extract_strided_slice %14 {offsets = [0, 64], sizes = [8, 32], strides = [1, 1]} : vector<8x128xf32> to vector<8x32xf32>
    %28 = math.tanh %27 : vector<8x32xf32>
    %29 = vector.extract_strided_slice %14 {offsets = [0, 96], sizes = [8, 32], strides = [1, 1]} : vector<8x128xf32> to vector<8x32xf32>
    %30 = arith.negf %29 : vector<8x32xf32>
    %31 = math.exp %30 : vector<8x32xf32>
    %cst_16 = arith.constant 1.000000e+00 : f32
    %32 = vector.broadcast %cst_16 : f32 to vector<8x32xf32>
    %33 = arith.addf %32, %31 : vector<8x32xf32>
    %34 = arith.divf %32, %33 : vector<8x32xf32>
    %35 = arith.mulf %26, %6 : vector<8x32xf32>
    %36 = arith.mulf %20, %28 : vector<8x32xf32>
    %37 = arith.addf %35, %36 : vector<8x32xf32>
    %38 = math.tanh %37 : vector<8x32xf32>
    %39 = arith.mulf %34, %38 : vector<8x32xf32>
    %c0_17 = arith.constant 0 : index
    %c0_18 = arith.constant 0 : index
    %40 = vector.load %arg9[%c0_17, %c0_18] : memref<8x32xf32, #tpu.memory_space<vmem>>, vector<8x32xf32>
    tpu.vector_store %arg9[%c0_17, %c0_18], %37 {strides = array<i32>} : memref<8x32xf32, #tpu.memory_space<vmem>>, vector<8x32xf32>,
    %c0_19 = arith.constant 0 : index
    %c0_20 = arith.constant 0 : index
    %41 = vector.load %arg8[%c0_19, %c0_20] : memref<8x32xf32, #tpu.memory_space<vmem>>, vector<8x32xf32>
    tpu.vector_store %arg8[%c0_19, %c0_20], %39 {strides = array<i32>} : memref<8x32xf32, #tpu.memory_space<vmem>>, vector<8x32xf32>,
    %c7_i32 = arith.constant 7 : i32
    %42 = arith.cmpi eq, %arg0, %c7_i32 : i32
    %43 = arith.extui %42 : i1 to i32
    %c0_i32_21 = arith.constant 0 : i32
    %44 = arith.cmpi ne, %43, %c0_i32_21 : i32
    scf.if %44 {
      %c0_22 = arith.constant 0 : index
      %c0_23 = arith.constant 0 : index
      %45 = vector.load %arg5[%c0_22, %c0_23] : memref<32x1xf32, #tpu.memory_space<vmem>>, vector<32x1xf32>
      %cst_24 = arith.constant dense<0.000000e+00> : vector<8x1xf32>
      %46 = tpu.matmul %39, %45, %cst_24 {dimension_numbers = #tpu.dot_dimension_numbers<[1], [0], [0], [1], [0, 0, 1, 1], [], []>} : vector<8x32xf32>, vector<32x1xf32>, vector<8x1xf32> -> vector<8x1xf32>
      %c0_25 = arith.constant 0 : index
      %c0_26 = arith.constant 0 : index
      %47 = vector.load %arg6[%c0_25, %c0_26] : memref<1x1xf32, #tpu.memory_space<vmem>>, vector<1x1xf32>
      %48 = vector.broadcast %47 : vector<1x1xf32> to vector<8x1xf32>
      %49 = arith.addf %46, %48 : vector<8x1xf32>
      %c0_27 = arith.constant 0 : index
      %c0_28 = arith.constant 0 : index
      %50 = vector.load %arg7[%c0_27, %c0_28] : memref<8x1xf32, #tpu.memory_space<vmem>>, vector<8x1xf32>
      tpu.vector_store %arg7[%c0_27, %c0_28], %49 {strides = array<i32>} : memref<8x1xf32, #tpu.memory_space<vmem>>, vector<8x1xf32>,
    } else {
    }
    return
  }
  func.func @transform_0(%arg0: i32) -> (i32, i32, i32) {
    %c0_i32 = arith.constant 0 : i32
    %c0_i32_0 = arith.constant 0 : i32
    %c0_i32_1 = arith.constant 0 : i32
    return %arg0, %c0_i32, %c0_i32_0 : i32, i32, i32
  }
  func.func @transform_1(%arg0: i32) -> (i32, i32) {
    %c0_i32 = arith.constant 0 : i32
    %c0_i32_0 = arith.constant 0 : i32
    %c0_i32_1 = arith.constant 0 : i32
    return %c0_i32, %c0_i32_0 : i32, i32
  }
  func.func @transform_2(%arg0: i32) -> (i32, i32) {
    %c0_i32 = arith.constant 0 : i32
    %c0_i32_0 = arith.constant 0 : i32
    %c0_i32_1 = arith.constant 0 : i32
    return %c0_i32, %c0_i32_0 : i32, i32
  }
  func.func @transform_3(%arg0: i32) -> (i32, i32) {
    %c0_i32 = arith.constant 0 : i32
    %c0_i32_0 = arith.constant 0 : i32
    %c0_i32_1 = arith.constant 0 : i32
    return %c0_i32, %c0_i32_0 : i32, i32
  }
  func.func @transform_4(%arg0: i32) -> (i32, i32) {
    %c0_i32 = arith.constant 0 : i32
    %c0_i32_0 = arith.constant 0 : i32
    %c0_i32_1 = arith.constant 0 : i32
    return %c0_i32, %c0_i32_0 : i32, i32
  }
  func.func @transform_5(%arg0: i32) -> (i32, i32) {
    %c0_i32 = arith.constant 0 : i32
    %c0_i32_0 = arith.constant 0 : i32
    %c0_i32_1 = arith.constant 0 : i32
    return %c0_i32, %c0_i32_0 : i32, i32
  }
  func.func @transform_6(%arg0: i32) -> (i32, i32) {
    %c0_i32 = arith.constant 0 : i32
    %c0_i32_0 = arith.constant 0 : i32
    %c0_i32_1 = arith.constant 0 : i32
    return %c0_i32, %c0_i32_0 : i32, i32
  }
}

</mosaic_0001>

<bundles_post_ra>
// kernel: tpu_custom_call.1
= control target key start
LH: loop header
LB: loop body
LE: loop exit
PB: predicated region body
PF: predicated region fallthrough
CT: control target
= control target key end

     0   :  { %s849_s0 = inlined_call_operand.hbm [shape: f32[8,8,16], index: 0, kind: input, shape index: {}]   ;;  %s850_s1 = inlined_call_operand.hbm [shape: f32[16,128], index: 1, kind: input, shape index: {}]   ;;  %s851_s2 = inlined_call_operand.vmem [shape: f32[32,128], index: 2, kind: input, shape index: {}]   ;;  %s852_s3 = inlined_call_operand.vmem [shape: f32[1,128], index: 3, kind: input, shape index: {}]   ;;  %s853_s4 = inlined_call_operand.vmem [shape: f32[32,1], index: 4, kind: input, shape index: {}]   ;;  %s854_s5 = inlined_call_operand.<no memory space> [shape: f32[1,1], index: 5, kind: input, shape index: {}]   ;;  %s855_s6 = inlined_call_operand.vmem [shape: f32[8,1], index: 6, kind: output, shape index: {}]  }
   0x1   :  { %v11_v0 = vstv %s854_s5 }
   0x2   :  { %12 = vst [vmem:[#allocation4] sm:$0x1] %v11_v0 }
   0x3   :  { %13 = vsyncpa [#allocation6], 0 }
   0x4   :  { %15 = vsyncpa [#allocation6 + $0x1], 0 }
   0x5   :  { %16 = vsyncpa [#allocation8], 0  ;;  %s708_s23 = smov 0   ;;  %s710_s24 = smov 0  }
   0x6   :  { %s712_s25 = smov 0   ;;  %s714_s26 = smov 0  }
   0x7 LB: > { %s190_s28 = sshll.u32 %s850_s1, 4  ;;  %s730_s29 = sadd.s32 4294967295, %s661_s26   ;;  %s661_s26 = sphi %s714_s26, %s862_s26   ;;  %s657_s25 = sphi %s712_s25, %s861_s25   ;;  %s653_s24 = sphi %s710_s24, %s860_s24   ;;  %s649_s23 = sphi %s708_s23, %s859_s23   ;;  %s191_s28 = int_to_ptr.hbm [resolvable:$true] %s190_s28 }
   0x8   : > { %p481_p0 = scmp.ge.s32.totalorder %s661_s26, 1  ;;  %p43_p1 = scmp.eq.s32.totalorder %s730_s29, 0 }
   0x9   : > { %p179_p2 = scmp.lt.s32.totalorder %s661_s26, 9  ;;  %p482_p3 = scmp.ne.s32.totalorder %s730_s29, 0 }
   0xa   : > { %s663_s7 = smov [#allocation7]   ;;  %s664_s9 = smov 128  }
   0xb   : > { %p736_p4 = pnand %p481_p0, %p179_p2  ;;  %s192_s8 = sshll.u32 %s663_s7, 4  ;;  %s193_s8 = int_to_ptr.vmem [resolvable:$true] %s192_s8 }
   0xc   : > { %s665_s10 = smov 8   ;;  %s745_s11 = sadd.s32 1, %s661_s26  }
   0xd   : > { %p503_p5 = pneg %p736_p4  ;;  %s26_s12 = ssub.s32 %s661_s26, %s745_s11 }
   0xe   : > { %s29_s13 = sadd.s32 1, %s657_s25  ;;  %p27_p7 = scmp.eq.s32.totalorder %s26_s12, 0 }
   0xf   : > { %p504_p6 = pnand %p503_p5, %p43_p1  ;;  %p36_p8 = scmp.ne.s32.totalorder %s657_s25, %s653_s24 }
  0x10   : > { %p37_p9 = scmp.eq.s32.totalorder %s661_s26, 0  ;;  %p42_p10 = scmp.ne.s32.totalorder %s653_s24, %s649_s23 }
  0x11   : > { %506 = dma.hbm_to_vmem [thread:$0]  (!%p504_p6), %s191_s28, 256, %s193_s8, [#allocation8], %s664_s9, %s664_s9, %s665_s10  }
  0x12   : > { %s755_s14 = scalar_select %p27_p7, %s657_s25, %s29_s13  }
  0x13   : > { %p38_p11 = por %p37_p9, %p36_p8  ;;  %p759_p12 = por %p43_p1, %p42_p10 }
  0x14   : > { %p512_p13 = scmp.lt.s32.totalorder %s661_s26, 8  ;;  %s218_s16 = sand.u32 1, %s657_s25  }
  0x15   : > { %s484_s17 = sshll.u32 %s218_s16, 3  ;;  %s485_s18 = sshll.u32 %s661_s26, 3 }
  0x16   : > { %s226_s21 = scalar_lea.hbm %s849_s0, %s485_s18  ;;  %s222_s22 = scalar_lea.vmem [#allocation5], %s484_s17 }
  0x17   : > { %s230_s5 = sshll.u32 %s222_s22, 4  ;;  %s228_s27 = sshll.u32 %s226_s21, 4  ;;  %s231_s5 = int_to_ptr.vmem [resolvable:$true] %s230_s5  ;;  %s229_s27 = int_to_ptr.hbm [resolvable:$true] %s228_s27 }
  0x18   : > { %p769_p0 = pnand %p512_p13, %p38_p11  ;;  %s219_s28 = scalar_lea.sflag [#allocation6], %s218_s16 }
  0x19   : > { %s593_s7 = sshra.s32 %s229_s27, 4  ;;  %s600_s10 = scalar_lea.hbm %s849_s0, 64  ;;  %s594_s7 = int_to_ptr.hbm [resolvable:$true] %s593_s7 }
  0x1a   : > { %s595_s8 = scalar_lea.hbm %s594_s7, 8  ;;  %p597_p5 = pneg %p769_p0 }
  0x1b   : > { %p596_p2 = scmp.ne.s32.totalorder %s594_s7, %s595_s8  ;;  %p601_p8 = scmp.lt.s32.totalorder %s594_s7, %s849_s0 }
  0x1c   : > { %p602_p9 = scmp.lt.s32.totalorder %s600_s10, %s595_s8 }
  0x1d   : > { %p598_p6 = pnand %p597_p5, %p596_p2 }
  0x1e   : > { %p603_p10 = por %p602_p9, %p601_p8 }
  0x1f   : > { %p599_p7 = pneg %p598_p6 }
  0x21   : > { %p604_p11 = pnand %p603_p10, %p599_p7 }
  0x23   : > { %607 = shalt.err (!%p604_p11)
}
  0x24   : > { %510 = dma.hbm_to_vmem [thread:$0]  (!%p769_p0), %s229_s27, 128, %s231_s5, %s219_s28  }
  0x25   : > { %239 = sbr.rel (%p736_p4) target bundleno = 785 (0x311), region = 44  ;;  %s241_s16 = sand.u32 (!%p736_p4), 1, %s653_s24  }
  0x26   : > { %s487_s17 = sshll.u32 (!%p736_p4), %s241_s16, 3  ;;  %s242_s18 = scalar_lea.sflag (!%p736_p4), [#allocation6], %s241_s16 }
  0x27   : > { %s245_s19 = scalar_lea.vmem (!%p736_p4), [#allocation5], %s487_s17 }
  0x2a   : > { %640 = dma.done.wait (%p759_p12), %s242_s18, 128  }
  0x2b   : > { %642 = vsyncadd (%p759_p12), %s242_s18, 4294967168 }
  0x2c   : > { %644 = dma.done.wait (%p43_p1), [#allocation8], 256  }
  0x2d   : > { %646 = vsyncadd (%p43_p1), [#allocation8], 4294967040  ;;  %278 = sbr.rel (%p482_p3) target bundleno = 53 (0x35), region = 56 }
  0x32   : > { %vm279_vm0 = vcmask 261120   ;;  %v666_v1 = vmov 0.0  }
  0x33   : > { %280 = vst.msk [vmem:[#allocation2] sm:$0xff] %vm279_vm0, %v666_v1 }
  0x34   : > { %281 = vst.msk [vmem:[#allocation3] sm:$0xff] %vm279_vm0, %v666_v1 }
  0x35 PF: > { %v290_v2 = vld [vmem:[%s851_s2 + $0x18] sm:$0xff]  ;;  %v289_v3 = vld [vmem:[%s851_s2 + $0x10] sm:$0xff]  ;;  %v285_v5 = vld [vmem:[#allocation7] sm:$0xff]  ;;  %vm315_vm1 = vcmask 130048   ;;  %vm291_vm2 = vcmask 261120   ;;  %s667_s8 = smov 64  }
  0x36   : > { %307 = vmatpush.msra.mxu0 %v290_v2  ;;  %v286_v4 = vld [vmem:[#allocation7 + $0x8] sm:$0xff]  ;;  %v282_v7 = vld [vmem:[%s245_s19] sm:$0xff]  ;;  %s668_s26 = smov 32   ;;  %s669_s9 = smov 96  }
  0x37   : > { %v288_v6 = vld [vmem:[%s851_s2 + $0x8] sm:$0xff]  ;;  %333 = vmatpush.msra.mxu1 %v286_v4  ;;  %v287_v8 = vld [vmem:[%s851_s2] sm:$0xff]  ;;  %p493_p1 = scmp.ne.s32.totalorder %s730_s29, 7 }
  0x38   : > { %308 = vmatpush.msra.mxu0 %v289_v3  ;;  %v553_v11 = vld [vmem:[%s852_s3] ss:$0 sm:$0xff] }
  0x39   : > { %334 = vmatpush.msra.mxu1 %v285_v5 }
  0x3a   : > { %309 = vmatpush.msra.mxu0 %v288_v6  ;;  %v283_v9 = vld [vmem:[#allocation2] sm:$0xff]  ;;  %491 = vmatmul.msk.f32.vlgmr.msra.gmra.mxu1 %vm315_vm1, %v282_v7 }
  0x3b   : > { %v284_v16 = vld [vmem:[#allocation3] sm:$0xff] }
  0x3c   : > { %310 = vmatpush.msra.mxu0 %v287_v8 }
  0x3d   : > { %490 = vmatmul.msk.f32.vlgmr.msra.gmra.mxu0 %vm291_vm2, %v283_v9 }
  0xb7   : > { %v336_v10 = vpop.f32.mrf.mxu1 }
  0xba   : > { %v312_v12 = vpop.f32.mrf.mxu0 }
  0xbb   : > { %v337_v13 = vadd.f32 %v336_v10, %v312_v12 }
  0xbd   : > { %v343_v14 = vadd.f32 %v553_v11, %v337_v13 }
  0xbf   : > { %554 = vtanh.f32 %v343_v14  ;;  %v492_v17 = vmul.f32 -1.442695, %v343_v14 }
  0xc1   : > { %556 = vpow2.f32 %v492_v17 }
  0xc5   : > { %v555_v15 = vpop.eup %554 }
  0xc6   : > { %370 = vrot.lane.b32.xlu0 %v555_v15, %s667_s8 }
  0xc7   : > { %v557_v18 = vpop.eup %556 }
  0xc8   : > { %v347_v19 = vadd.f32 1.0, %v557_v18 }
  0xca   : > { %558 = vrcp.f32 %v347_v19  ;;  %v359_v25 = vand.u32 2147483648, %v347_v19  ;;  %vm353_vm4 = vweird.f32 %v347_v19  ;;  %v357_v26 = vand.u32 2147483647, %v347_v19 }
  0xcc   : > { %v360_v28 = vor.u32 1.1754944e-38, %v359_v25  ;;  %vm358_vm6 = vcmp.eq.f32.partialorder %v357_v26, 8.507059e+37 }
  0xce   : > { %365 = vrot.lane.b32.xlu0 %v284_v16, %s668_s26 }
  0xd0   : > { %v559_v20 = vpop.eup %558 }
  0xd1   : > { %v349_v21 = vmul.f32 %v559_v20, %v347_v19  ;;  %vm354_vm3 = vweird.f32 %v559_v20 }
  0xd2   : > { %vm355_vm5 = vmor %vm353_vm4, %vm354_vm3 }
  0xd3   : > { %v350_v22 = vsub.f32 1.0, %v349_v21 }
  0xd5   : > { %v351_v23 = vmul.f32 %v559_v20, %v350_v22 }
  0xd7   : > { %v352_v24 = vadd.f32 %v559_v20, %v351_v23 }
  0xd9   : > { %v356_v27 = vsel %vm355_vm5, %v559_v20, %v352_v24 }
  0xda   : > { %v361_v30 = vsel %vm358_vm6, %v360_v28, %v356_v27 }
 0x138   : > { %v371_v29 = vpop.permute.xlu0 %370 }
 0x139   : > { %v373_v31 = vmul.f32 %v371_v29, %v361_v30 }
 0x13b   : > { %375 = vrot.lane.b32.xlu1 %v373_v31, %s668_s26 }
 0x140   : > { %v366_v32 = vpop.permute.xlu0 %365 }
 0x141   : > { %v368_v33 = vmul.f32 %v366_v32, %v361_v30 }
 0x1ad   : > { %v376_v34 = vpop.permute.xlu1 %375 }
 0x1ae   : > { %v378_v35 = vadd.f32 %v376_v34, %v368_v33 }
 0x1b0   : > { %560 = vtanh.f32 %v378_v35  ;;  %386 = vrot.lane.b32.xlu2 %v378_v35, %s669_s9 }
 0x1b6   : > { %v561_v36 = vpop.eup %560 }
 0x1b7   : > { %381 = vrot.lane.b32.xlu1 %v561_v36, %s667_s8 }
 0x20a   : > { %v387_v37 = vpop.permute.xlu2 %386 }
 0x20b   : > { %389 = vst.msk [vmem:[#allocation3] sm:$0xff] %vm291_vm2, %v387_v37 }
 0x229   : > { %v382_v38 = vpop.permute.xlu1 %381 }
 0x22a   : > { %v384_v39 = vmul.f32 %v382_v38, %v361_v30 }
 0x22c   : > { %391 = vrot.lane.b32.xlu2 %v384_v39, %s668_s26 }
 0x283   : > { %398 = sbr.rel (%p493_p1) target bundleno = 785 (0x311), region = 60 }
 0x286   : > { %v392_v40 = vpop.permute.xlu2 %391 }
 0x287   : > { %394 = vst.msk [vmem:[#allocation2] sm:$0xff] %vm291_vm2, %v392_v40 }
 0x288   : > { %v402_v41 = vld [vmem:[%s853_s4 + $0x18] sm:$0xff]  ;;  %v401_v42 = vld [vmem:[%s853_s4 + $0x10] sm:$0xff]  ;;  %v400_v43 = vld [vmem:[%s853_s4 + $0x8] sm:$0xff]  ;;  %vm429_vm7 = vcmask 7168  }
 0x289   : > { %421 = vmatpush.msra.mxu0 %v402_v41  ;;  %v399_v44 = vld [vmem:[%s853_s4] sm:$0xff]  ;;  %v562_v45 = vld [vmem:[#allocation4] ss:$0 sm:$0xff] }
 0x28b   : > { %422 = vmatpush.msra.mxu0 %v401_v42 }
 0x28d   : > { %423 = vmatpush.msra.mxu0 %v400_v43 }
 0x28f   : > { %424 = vmatpush.msra.mxu0 %v399_v44 }
 0x290   : > { %494 = vmatmul.msk.f32.vlgmr.msra.gmra.mxu0 %vm291_vm2, %v392_v40 }
 0x30d   : > { %v426_v46 = vpop.f32.mrf.mxu0 }
 0x30e   : > { %v427_v47 = vadd.f32 %v562_v45, %v426_v46 }
 0x310   : > { %430 = vst.msk [vmem:[%s855_s6] sm:$0xff] %vm429_vm7, %v427_v47 }
 0x311 PF: > { %p19_p3 = scmp.ge.s32.totalorder %s745_s11, 10   ;;  %s859_s23 = smov %s653_s24 }
 0x312   : > { %s860_s24 = smov %s657_s25  ;;  %s861_s25 = smov %s755_s14 }
 0x313   : > { %s862_s26 = smov %s745_s11  ;;  %21 = sbr.rel (!%p19_p3) target bundleno = 7 (0x7), region = 92 }
 0x318   :  { %442 = vsyncpa [#allocation6], 1 }
 0x319   :  { %444 = vsyncpa [#allocation6 + $0x1], 1 }
 0x31a   :  { %445 = vsyncpa [#allocation8], 1 }

</bundles_post_ra>
